<compile_context>
chip_gen: v7x
topology: tpu7x:2x2x1
jax: 0.10.0
libtpu: 0.0.40
codegen_flags: <defaults>
</compile_context>

<pallas_src>
import functools

import jax
import jax.numpy as jnp
from jax.experimental import pallas as pl
from jax.experimental.pallas import tpu as pltpu

PMIN_STAB = 1e-20


def _round_up(x, m):
    return ((x + m - 1) // m) * m


def mlp_chpm_pd_kernel(hx_ref, w1_ref, b1_ref, w2_ref, b2_ref, w3_ref, b3_ref,
                       pt_ref, x_scratch, *, out_size, in_size):
    hx = hx_ref[...]                                   # (tb, total) f32, unpadded lanes
    total = hx.shape[1]
    pmax = hx[:, total - 1:total]                      # (tb, 1): last real column is Pmax

    # Lane-pad log10(channels) to the MXU-aligned width via VMEM scratch.  Pad lanes are
    # zeroed every step (padded W1 rows are zero, but stale VMEM bits could decode as NaN).
    x_scratch[...] = jnp.zeros_like(x_scratch)
    x_scratch[:, :in_size] = jnp.log10(hx[:, out_size:])
    x = x_scratch[...].astype(jnp.bfloat16)            # (tb, in_p) bf16 for the MXU

    # basic_mlp_nc: Linear/ReLU stack.  bf16 matmuls, f32 accumulation + f32 bias/ReLU.
    h = jnp.dot(x, w1_ref[...], preferred_element_type=jnp.float32) + b1_ref[...]
    h = jnp.maximum(h, 0.0)
    h = jnp.dot(h.astype(jnp.bfloat16), w2_ref[...],
                preferred_element_type=jnp.float32) + b2_ref[...]
    h = jnp.maximum(h, 0.0)
    # TODO(synk): nn.Dropout is identity at inference; training-mode dropout not implemented.
    z = jnp.dot(h.astype(jnp.bfloat16), w3_ref[...],
                preferred_element_type=jnp.float32) + b3_ref[...]
    pt_scaled = jnp.maximum(z, 0.0)                    # final activation (default 'relu')
    # pt = clamp(pmax * pt_scaled, min=PMIN_STAB)
    pt_ref[...] = jnp.maximum(pmax * pt_scaled, PMIN_STAB)


def prepare_mlp_chpm_pd_params(W1, b1, W2, b2, W3, b3, out_size):
    """Pad/cast the weights once at model-load time (hoisted out of the per-call path)."""
    in_size, h1 = W1.shape
    h2 = W2.shape[1]
    assert W2.shape[0] == h1 and W3.shape[0] == h2 and W3.shape[1] == out_size

    in_p, h1_p, h2_p, out_p = (_round_up(d, 128) for d in (in_size, h1, h2, out_size))

    # Padded W rows/cols are zero, so in-kernel lane padding never leaks into real outputs.
    w1_p = jnp.zeros((in_p, h1_p), jnp.bfloat16).at[:in_size, :h1].set(
        jnp.asarray(W1, jnp.bfloat16))
    b1_p = jnp.zeros((1, h1_p), jnp.float32).at[:, :h1].set(
        jnp.asarray(b1, jnp.float32).reshape(1, -1))
    w2_p = jnp.zeros((h1_p, h2_p), jnp.bfloat16).at[:h1, :h2].set(
        jnp.asarray(W2, jnp.bfloat16))
    b2_p = jnp.zeros((1, h2_p), jnp.float32).at[:, :h2].set(
        jnp.asarray(b2, jnp.float32).reshape(1, -1))
    w3_p = jnp.zeros((h2_p, out_p), jnp.bfloat16).at[:h2, :out_size].set(
        jnp.asarray(W3, jnp.bfloat16))
    b3_p = jnp.zeros((1, out_p), jnp.float32).at[:, :out_size].set(
        jnp.asarray(b3, jnp.float32).reshape(1, -1))

    return dict(w1=w1_p, b1=b1_p, w2=w2_p, b2=b2_p, w3=w3_p, b3=b3_p,
                in_size=in_size, out_size=out_size,
                in_p=in_p, h1_p=h1_p, h2_p=h2_p, out_p=out_p)


def _pick_batch_tile(batch, tb):
    tb = max(8, _round_up(tb, 8))                # (8,128) rule: sublane dim multiple of 8
    tb = min(tb, _round_up(batch, 8))
    # v7x has 2 TensorCores/chip: keep >= 2 grid steps on the "parallel" batch axis whenever
    # the batch allows, so neither core sits idle.  (Harmless on 1-TC v5e/v6e.)
    if batch > 8 and _round_up(batch, tb) // tb < 2:
        tb = max(8, _round_up(pl.cdiv(batch, 2), 8))
    return tb


def mlp_chpm_pd_forward(Hx, params, *, tb=512):
    batch, total = Hx.shape
    in_size, out_size = params["in_size"], params["out_size"]
    in_p, h1_p, h2_p, out_p = params["in_p"], params["h1_p"], params["h2_p"], params["out_p"]
    assert total - out_size == in_size, "Hx width must be out_size + in_size"

    tb = _pick_batch_tile(batch, tb)
    batch_p = _round_up(batch, tb)
    grid = (batch_p // tb,)

    Hx = jnp.asarray(Hx, jnp.float32)
    if batch_p != batch:
        # Pad rows with 1.0 (log10(1)=0, Pmax=1) so no NaN/inf appears in discarded pad rows.
        Hx = jnp.concatenate(
            [Hx, jnp.ones((batch_p - batch, total), jnp.float32)], axis=0)

    # VMEM budget: double-buffered per-tile I/O + resident (double-counted for safety)
    # weights/biases + lane-pad scratch + headroom; capped at 32 MiB (v7x has 64 MiB/TC).
    f32, bf16 = 4, 2
    in_lanes = _round_up(total, 128)
    io_bytes = 2 * tb * (in_lanes + out_p) * f32
    w_bytes = 2 * ((in_p * h1_p + h1_p * h2_p + h2_p * out_p) * bf16
                   + (h1_p + h2_p + out_p) * f32)
    scratch_bytes = tb * in_p * f32
    vmem_limit = int(min(max(io_bytes + w_bytes + scratch_bytes + (4 << 20), 16 << 20),
                         32 << 20))

    tiled = lambda i: (i, 0)       # per-batch-tile operands
    resident = lambda i: (0, 0)    # constant block -> weights stay resident across grid steps

    kernel = functools.partial(mlp_chpm_pd_kernel, out_size=out_size, in_size=in_size)

    pt_p = pl.pallas_call(
        kernel,
        out_shape=jax.ShapeDtypeStruct((batch_p, out_p), jnp.float32),
        grid_spec=pltpu.PrefetchScalarGridSpec(
            num_scalar_prefetch=0,
            grid=grid,
            in_specs=[
                pl.BlockSpec((tb, total), tiled),      # Hx, unpadded lanes (full last dim)
                pl.BlockSpec((in_p, h1_p), resident),  # bf16 weights
                pl.BlockSpec((1, h1_p), resident),     # f32 biases
                pl.BlockSpec((h1_p, h2_p), resident),
                pl.BlockSpec((1, h2_p), resident),
                pl.BlockSpec((h2_p, out_p), resident),
                pl.BlockSpec((1, out_p), resident),
            ],
            out_specs=pl.BlockSpec((tb, out_p), tiled),
            scratch_shapes=[pltpu.VMEM((tb, in_p), jnp.float32)],  # lane-padded log10 input
        ),
        compiler_params=pltpu.CompilerParams(
            dimension_semantics=("parallel",),         # batch tiles are independent
            vmem_limit_bytes=vmem_limit,
        ),
    )(Hx, params["w1"], params["b1"], params["w2"], params["b2"],
      params["w3"], params["b3"])

    # Consumers that can accept the lane-padded (batch_p, out_p) layout may skip this slice.
    return pt_p[:batch, :out_size]


def reference_forward(Hx, W1, b1, W2, b2, W3, b3, out_size):
    """Full-f32 reference matching the PyTorch module exactly."""
    channels, pmax = Hx[:, out_size:], Hx[:, -1:]
    x = jnp.log10(channels)
    h = jnp.maximum(x @ W1 + b1, 0.0)
    h = jnp.maximum(h @ W2 + b2, 0.0)
    pt_scaled = jnp.maximum(h @ W3 + b3, 0.0)
    return jnp.maximum(pmax * pt_scaled, PMIN_STAB)


def reference_forward_bf16(Hx, W1, b1, W2, b2, W3, b3, out_size):
    """Reference using the kernel's bf16-matmul / f32-accumulate precision."""
    channels, pmax = Hx[:, out_size:], Hx[:, -1:]
    mm = lambda a, w: jnp.dot(a.astype(jnp.bfloat16), jnp.asarray(w, jnp.bfloat16),
                              preferred_element_type=jnp.float32)
    x = jnp.log10(channels)
    h = jnp.maximum(mm(x, W1) + b1, 0.0)
    h = jnp.maximum(mm(h, W2) + b2, 0.0)
    pt_scaled = jnp.maximum(mm(h, W3) + b3, 0.0)
    return jnp.maximum(pmax * pt_scaled, PMIN_STAB)


if __name__ == "__main__":
    out_size = 16                 # self.size
    in_size = 17                  # MLP input width: 16 channel gains + Pmax column
    h_sizes = (32, 32)
    batch = 256                   # -> two 128-row batch tiles (pipelined / megacore-parallel)

    key = jax.random.PRNGKey(0)
    k_extra, k_ch, k_pm, k_w1, k_w2, k_w3 = jax.random.split(key, 6)

    # Hx layout: [:, :out_size] extra columns (unused by this forward) |
    #            [:, out_size:-1] channel gains | [:, -1] Pmax
    extras = jax.random.uniform(k_extra, (batch, out_size), jnp.float32, minval=0.1, maxval=1.0)
    gains = jax.random.uniform(k_ch, (batch, in_size - 1), jnp.float32, minval=0.1, maxval=10.0)
    pmax = jax.random.uniform(k_pm, (batch, 1), jnp.float32, minval=0.5, maxval=2.0)
    Hx = jnp.concatenate([extras, gains, pmax], axis=1)          # (256, 33)

    W1 = 0.2 * jax.random.normal(k_w1, (in_size, h_sizes[0]), jnp.float32)
    b1 = jnp.full((h_sizes[0],), 0.05, jnp.float32)
    W2 = 0.2 * jax.random.normal(k_w2, (h_sizes[0], h_sizes[1]), jnp.float32)
    b2 = jnp.full((h_sizes[1],), 0.05, jnp.float32)
    W3 = 0.2 * jax.random.normal(k_w3, (h_sizes[1], out_size), jnp.float32)
    b3 = jnp.full((out_size,), 0.05, jnp.float32)

    # Pad / cast weights once (model-load time), reuse on every forward call.
    params = prepare_mlp_chpm_pd_params(W1, b1, W2, b2, W3, b3, out_size)

    pt = jax.block_until_ready(mlp_chpm_pd_forward(Hx, params, tb=512))

    pt_ref_bf16 = reference_forward_bf16(Hx, W1, b1, W2, b2, W3, b3, out_size)
    pt_ref_f32 = reference_forward(Hx, W1, b1, W2, b2, W3, b3, out_size)

    assert pt.shape == (batch, out_size)
    # Tight check against a reference that uses the kernel's bf16/f32-acc precision.
    assert jnp.allclose(pt, pt_ref_bf16, atol=1e-3, rtol=5e-3), \
        float(jnp.max(jnp.abs(pt - pt_ref_bf16)))
    # Loose check against the full-f32 PyTorch-equivalent semantics (bf16 matmul error budget).
    assert jnp.allclose(pt, pt_ref_f32, atol=1e-1, rtol=1e-1), \
        float(jnp.max(jnp.abs(pt - pt_ref_f32)))

    print("KERNEL_OK")
</pallas_src>

<mosaic_0001>
module attributes {stable_mosaic.version = 11 : i64} {
  func.func @mlp_chpm_pd_kernel(%arg0: i32, %arg1: memref<128x33xf32, #tpu.memory_space<vmem>>, %arg2: memref<128x128xbf16, #tpu.memory_space<vmem>>, %arg3: memref<1x128xf32, #tpu.memory_space<vmem>>, %arg4: memref<128x128xbf16, #tpu.memory_space<vmem>>, %arg5: memref<1x128xf32, #tpu.memory_space<vmem>>, %arg6: memref<128x128xbf16, #tpu.memory_space<vmem>>, %arg7: memref<1x128xf32, #tpu.memory_space<vmem>>, %arg8: memref<128x128xf32, #tpu.memory_space<vmem>>, %arg9: memref<128x128xf32, #tpu.memory_space<vmem>>) attributes {dimension_semantics = [#tpu.dimension_semantics<parallel>], iteration_bounds = array<i64: 2>, scalar_prefetch = 0 : i64, scratch_operands = 1 : i64, tpu.core_type = #tpu.core_type<tc>, window_params = [{transform_indices = @transform_0, window_bounds = array<i64: 128, 33>}, {pipeline_mode = #tpu.pipeline_mode<synchronous>, transform_indices = @transform_1, window_bounds = array<i64: 128, 128>}, {pipeline_mode = #tpu.pipeline_mode<synchronous>, transform_indices = @transform_2, window_bounds = array<i64: 1, 128>}, {pipeline_mode = #tpu.pipeline_mode<synchronous>, transform_indices = @transform_3, window_bounds = array<i64: 128, 128>}, {pipeline_mode = #tpu.pipeline_mode<synchronous>, transform_indices = @transform_4, window_bounds = array<i64: 1, 128>}, {pipeline_mode = #tpu.pipeline_mode<synchronous>, transform_indices = @transform_5, window_bounds = array<i64: 128, 128>}, {pipeline_mode = #tpu.pipeline_mode<synchronous>, transform_indices = @transform_6, window_bounds = array<i64: 1, 128>}, {transform_indices = @transform_7, window_bounds = array<i64: 128, 128>}]} {
    %c0 = arith.constant 0 : index
    %c0_0 = arith.constant 0 : index
    %0 = vector.load %arg1[%c0, %c0_0] : memref<128x33xf32, #tpu.memory_space<vmem>>, vector<128x33xf32>
    %1 = vector.extract_strided_slice %0 {offsets = [0, 32], sizes = [128, 1], strides = [1, 1]} : vector<128x33xf32> to vector<128x1xf32>
    %cst = arith.constant 0.000000e+00 : f32
    %2 = vector.broadcast %cst : f32 to vector<128x128xf32>
    %c0_1 = arith.constant 0 : index
    %c0_2 = arith.constant 0 : index
    %3 = vector.load %arg9[%c0_1, %c0_2] : memref<128x128xf32, #tpu.memory_space<vmem>>, vector<128x128xf32>
    tpu.vector_store %arg9[%c0_1, %c0_2], %2 {strides = array<i32>} : memref<128x128xf32, #tpu.memory_space<vmem>>, vector<128x128xf32>,
    %4 = vector.extract_strided_slice %0 {offsets = [0, 16], sizes = [128, 17], strides = [1, 1]} : vector<128x33xf32> to vector<128x17xf32>
    %5 = math.log %4 : vector<128x17xf32>
    %cst_3 = arith.constant 0.434294492 : f32
    %6 = vector.broadcast %cst_3 : f32 to vector<128x17xf32>
    %7 = arith.mulf %5, %6 : vector<128x17xf32>
    %c0_4 = arith.constant 0 : index
    %c0_5 = arith.constant 0 : index
    %8 = vector.load %arg9[%c0_4, %c0_5] : memref<128x128xf32, #tpu.memory_space<vmem>>, vector<128x17xf32>
    tpu.vector_store %arg9[%c0_4, %c0_5], %7 {strides = array<i32>} : memref<128x128xf32, #tpu.memory_space<vmem>>, vector<128x17xf32>,
    %c0_6 = arith.constant 0 : index
    %c0_7 = arith.constant 0 : index
    %9 = vector.load %arg9[%c0_6, %c0_7] : memref<128x128xf32, #tpu.memory_space<vmem>>, vector<128x128xf32>
    %10 = arith.truncf %9 : vector<128x128xf32> to vector<128x128xbf16>
    %c0_8 = arith.constant 0 : index
    %c0_9 = arith.constant 0 : index
    %11 = vector.load %arg2[%c0_8, %c0_9] : memref<128x128xbf16, #tpu.memory_space<vmem>>, vector<128x128xbf16>
    %cst_10 = arith.constant dense<0.000000e+00> : vector<128x128xf32>
    %12 = tpu.matmul %10, %11, %cst_10 {dimension_numbers = #tpu.dot_dimension_numbers<[1], [0], [0], [1], [0, 0, 1, 1], [], []>} : vector<128x128xbf16>, vector<128x128xbf16>, vector<128x128xf32> -> vector<128x128xf32>
    %c0_11 = arith.constant 0 : index
    %c0_12 = arith.constant 0 : index
    %13 = vector.load %arg3[%c0_11, %c0_12] : memref<1x128xf32, #tpu.memory_space<vmem>>, vector<1x128xf32>
    %14 = vector.broadcast %13 : vector<1x128xf32> to vector<128x128xf32>
    %15 = arith.addf %12, %14 : vector<128x128xf32>
    %cst_13 = arith.constant 0.000000e+00 : f32
    %16 = vector.broadcast %cst_13 : f32 to vector<128x128xf32>
    %17 = arith.maximumf %15, %16 : vector<128x128xf32>
    %18 = arith.truncf %17 : vector<128x128xf32> to vector<128x128xbf16>
    %c0_14 = arith.constant 0 : index
    %c0_15 = arith.constant 0 : index
    %19 = vector.load %arg4[%c0_14, %c0_15] : memref<128x128xbf16, #tpu.memory_space<vmem>>, vector<128x128xbf16>
    %cst_16 = arith.constant dense<0.000000e+00> : vector<128x128xf32>
    %20 = tpu.matmul %18, %19, %cst_16 {dimension_numbers = #tpu.dot_dimension_numbers<[1], [0], [0], [1], [0, 0, 1, 1], [], []>} : vector<128x128xbf16>, vector<128x128xbf16>, vector<128x128xf32> -> vector<128x128xf32>
    %c0_17 = arith.constant 0 : index
    %c0_18 = arith.constant 0 : index
    %21 = vector.load %arg5[%c0_17, %c0_18] : memref<1x128xf32, #tpu.memory_space<vmem>>, vector<1x128xf32>
    %22 = vector.broadcast %21 : vector<1x128xf32> to vector<128x128xf32>
    %23 = arith.addf %20, %22 : vector<128x128xf32>
    %cst_19 = arith.constant 0.000000e+00 : f32
    %24 = vector.broadcast %cst_19 : f32 to vector<128x128xf32>
    %25 = arith.maximumf %23, %24 : vector<128x128xf32>
    %26 = arith.truncf %25 : vector<128x128xf32> to vector<128x128xbf16>
    %c0_20 = arith.constant 0 : index
    %c0_21 = arith.constant 0 : index
    %27 = vector.load %arg6[%c0_20, %c0_21] : memref<128x128xbf16, #tpu.memory_space<vmem>>, vector<128x128xbf16>
    %cst_22 = arith.constant dense<0.000000e+00> : vector<128x128xf32>
    %28 = tpu.matmul %26, %27, %cst_22 {dimension_numbers = #tpu.dot_dimension_numbers<[1], [0], [0], [1], [0, 0, 1, 1], [], []>} : vector<128x128xbf16>, vector<128x128xbf16>, vector<128x128xf32> -> vector<128x128xf32>
    %c0_23 = arith.constant 0 : index
    %c0_24 = arith.constant 0 : index
    %29 = vector.load %arg7[%c0_23, %c0_24] : memref<1x128xf32, #tpu.memory_space<vmem>>, vector<1x128xf32>
    %30 = vector.broadcast %29 : vector<1x128xf32> to vector<128x128xf32>
    %31 = arith.addf %28, %30 : vector<128x128xf32>
    %cst_25 = arith.constant 0.000000e+00 : f32
    %32 = vector.broadcast %cst_25 : f32 to vector<128x128xf32>
    %33 = arith.maximumf %31, %32 : vector<128x128xf32>
    %34 = vector.broadcast %1 : vector<128x1xf32> to vector<128x128xf32>
    %35 = arith.mulf %34, %33 : vector<128x128xf32>
    %cst_26 = arith.constant 9.99999968E-21 : f32
    %36 = vector.broadcast %cst_26 : f32 to vector<128x128xf32>
    %37 = arith.maximumf %35, %36 : vector<128x128xf32>
    %c0_27 = arith.constant 0 : index
    %c0_28 = arith.constant 0 : index
    %38 = vector.load %arg8[%c0_27, %c0_28] : memref<128x128xf32, #tpu.memory_space<vmem>>, vector<128x128xf32>
    tpu.vector_store %arg8[%c0_27, %c0_28], %37 {strides = array<i32>} : memref<128x128xf32, #tpu.memory_space<vmem>>, vector<128x128xf32>,
    return
  }
  func.func @transform_0(%arg0: i32) -> (i32, i32) {
    %c0_i32 = arith.constant 0 : i32
    %c0_i32_0 = arith.constant 0 : i32
    return %arg0, %c0_i32 : i32, i32
  }
  func.func @transform_1(%arg0: i32) -> (i32, i32) {
    %c0_i32 = arith.constant 0 : i32
    %c0_i32_0 = arith.constant 0 : i32
    %c0_i32_1 = arith.constant 0 : i32
    return %c0_i32, %c0_i32_0 : i32, i32
  }
  func.func @transform_2(%arg0: i32) -> (i32, i32) {
    %c0_i32 = arith.constant 0 : i32
    %c0_i32_0 = arith.constant 0 : i32
    %c0_i32_1 = arith.constant 0 : i32
    return %c0_i32, %c0_i32_0 : i32, i32
  }
  func.func @transform_3(%arg0: i32) -> (i32, i32) {
    %c0_i32 = arith.constant 0 : i32
    %c0_i32_0 = arith.constant 0 : i32
    %c0_i32_1 = arith.constant 0 : i32
    return %c0_i32, %c0_i32_0 : i32, i32
  }
  func.func @transform_4(%arg0: i32) -> (i32, i32) {
    %c0_i32 = arith.constant 0 : i32
    %c0_i32_0 = arith.constant 0 : i32
    %c0_i32_1 = arith.constant 0 : i32
    return %c0_i32, %c0_i32_0 : i32, i32
  }
  func.func @transform_5(%arg0: i32) -> (i32, i32) {
    %c0_i32 = arith.constant 0 : i32
    %c0_i32_0 = arith.constant 0 : i32
    %c0_i32_1 = arith.constant 0 : i32
    return %c0_i32, %c0_i32_0 : i32, i32
  }
  func.func @transform_6(%arg0: i32) -> (i32, i32) {
    %c0_i32 = arith.constant 0 : i32
    %c0_i32_0 = arith.constant 0 : i32
    %c0_i32_1 = arith.constant 0 : i32
    return %c0_i32, %c0_i32_0 : i32, i32
  }
  func.func @transform_7(%arg0: i32) -> (i32, i32) {
    %c0_i32 = arith.constant 0 : i32
    %c0_i32_0 = arith.constant 0 : i32
    return %arg0, %c0_i32 : i32, i32
  }
}

</mosaic_0001>

<bundles_post_ra>
// kernel: tpu_custom_call.1
= control target key start
LH: loop header
LB: loop body
LE: loop exit
PB: predicated region body
PF: predicated region fallthrough
CT: control target
= control target key end

     0   :  { %12 = vsyncpa [#allocation4], 0  ;;  %s2024_s0 = inlined_call_operand.vmem [shape: f32[256,33], index: 0, kind: input, shape index: {}]   ;;  %s2025_s1 = inlined_call_operand.vmem [shape: bf16[128,128], index: 1, kind: input, shape index: {}]   ;;  %s2026_s2 = inlined_call_operand.vmem [shape: f32[1,128], index: 2, kind: input, shape index: {}]   ;;  %s2027_s3 = inlined_call_operand.vmem [shape: bf16[128,128], index: 3, kind: input, shape index: {}]   ;;  %s2028_s4 = inlined_call_operand.vmem [shape: f32[1,128], index: 4, kind: input, shape index: {}]   ;;  %s2029_s5 = inlined_call_operand.vmem [shape: bf16[128,128], index: 5, kind: input, shape index: {}]   ;;  %s2030_s6 = inlined_call_operand.vmem [shape: f32[1,128], index: 6, kind: input, shape index: {}]   ;;  %s2031_s7 = inlined_call_operand.hbm [shape: f32[256,128], index: 7, kind: output, shape index: {}]  }
   0x1   :  { %14 = vsyncpa [#allocation4 + $0x1], 0  ;;  %s1650_s24 = smov 0   ;;  %s1652_s25 = smov 0  }
   0x2   :  { %s1654_s26 = smov 0   ;;  %s1656_s27 = smov 0  }
   0x3 LB: > { %s1671_s28 = sadd.s32 4294967295, %s1602_s27   ;;  %s1238_s29 = sadd.s32 4294967294, %s1602_s27   ;;  %s1602_s27 = sphi %s1656_s27, %s2037_s27   ;;  %s1598_s26 = sphi %s1654_s26, %s2036_s26   ;;  %s1594_s25 = sphi %s1652_s25, %s2035_s25   ;;  %s1590_s24 = sphi %s1650_s24, %s2034_s24  }
   0x4   : > { %s1675_s30 = sadd.s32 1, %s1602_s27   ;;  %s179_s8 = sadd.s32 1, %s1598_s26 }
   0x5   : > { %s176_s9 = ssub.s32 %s1602_s27, %s1675_s30  ;;  %p189_p0 = scmp.ne.s32.totalorder %s1598_s26, %s1594_s25 }
   0x6   : > { %p177_p1 = scmp.eq.s32.totalorder %s176_s9, 0  ;;  %p190_p2 = scmp.eq.s32.totalorder %s1671_s28, 1 }
   0x7   : > { %p195_p3 = scmp.ne.s32.totalorder %s1594_s25, %s1590_s24  ;;  %p196_p4 = scmp.eq.s32.totalorder %s1238_s29, 1 }
   0x8   : > { %s1686_s10 = scalar_select %p177_p1, %s1598_s26, %s179_s8  }
   0x9   : > { %p1688_p5 = por %p190_p2, %p189_p0  ;;  %p1692_p6 = por %p196_p4, %p195_p3 }
   0xa   : > { %p1241_p7 = scmp.ge.s32.totalorder %s1602_s27, 1  ;;  %p241_p8 = scmp.lt.s32.totalorder %s1602_s27, 3 }
   0xc   : > { %p242_p9 = pnand %p1241_p7, %p241_p8 }
   0xd   : > { %s1243_s13 = sshll.u32 (!%p242_p9), %s1671_s28, 4  ;;  %v1484_v0 = vld [vmem:[%s2025_s1] sm:$0xff] (!%p242_p9)   ;;  %v1485_v1 = vld [vmem:[%s2025_s1 + $0x8] sm:$0xff] (!%p242_p9)   ;;  %v1604_v2 = vmov (!%p242_p9), 0.0   ;;  %v1486_v3 = vld [vmem:[%s2025_s1 + $0x10] sm:$0xff] (!%p242_p9)   ;;  %vm425_vm0 = vcmask (!%p242_p9), 138240  }
   0xe   : > { %245 = sbr.rel (%p242_p9) target bundleno = 877 (0x36d), region = 48  ;;  %p274_p10 = scmp.lt.s32.totalorder (!%p242_p9), %s1243_s13, 31  ;;  %1326 = vmatprep.subr.bf16.mxu0 (!%p242_p9), %v1484_v0  ;;  %299 = vst [vmem:[#allocation2 + $0x10] sm:$0xff] (!%p242_p9), %v1604_v2  ;;  %297 = vst [vmem:[#allocation2] sm:$0xff] (!%p242_p9), %v1604_v2  ;;  %v1487_v9 = vld [vmem:[%s2025_s1 + $0x18] sm:$0xff] (!%p242_p9)   ;;  %v1488_v13 = vld [vmem:[%s2025_s1 + $0x20] sm:$0xff] (!%p242_p9)  }
   0xf   : > { %298 = vst [vmem:[#allocation2 + $0x8] sm:$0xff] (!%p242_p9), %v1604_v2  ;;  %300 = vst [vmem:[#allocation2 + $0x18] sm:$0xff] (!%p242_p9), %v1604_v2  ;;  %1327 = vmatpush3.bf16.msra.mxu0 (!%p242_p9), %v1484_v0  ;;  %v1489_v16 = vld [vmem:[%s2025_s1 + $0x28] sm:$0xff] (!%p242_p9)   ;;  %v1490_v22 = vld [vmem:[%s2025_s1 + $0x30] sm:$0xff] (!%p242_p9)   ;;  %s270_s17 = sand.u32 (!%p242_p9), 1, %s1594_s25   ;;  %s1277_s20 = sshll.u32 (!%p242_p9), %s1671_s28, 11 }
  0x10   : > { %301 = vst [vmem:[#allocation2 + $0x20] sm:$0xff] (!%p242_p9), %v1604_v2  ;;  %302 = vst [vmem:[#allocation2 + $0x28] sm:$0xff] (!%p242_p9), %v1604_v2  ;;  %1328 = vmatprep.subr.bf16.mxu0 (!%p242_p9), %v1485_v1  ;;  %v1491_v40 = vld [vmem:[%s2025_s1 + $0x38] sm:$0xff] (!%p242_p9)   ;;  %s1974_s29 = scalar_lea.hbm (!%p242_p9), %s2031_s7, %s1277_s20  ;;  %s1983_s28 = scalar_lea.sflag (!%p242_p9), [#allocation4], %s270_s17 }
  0x11   : > { %303 = vst [vmem:[#allocation2 + $0x30] sm:$0xff] (!%p242_p9), %v1604_v2  ;;  %304 = vst [vmem:[#allocation2 + $0x38] sm:$0xff] (!%p242_p9), %v1604_v2  ;;  %s1607_s9 = smov (!%p242_p9), [#allocation3]  }
  0x12   : > { %305 = vst [vmem:[#allocation2 + $0x40] sm:$0xff] (!%p242_p9), %v1604_v2  ;;  %306 = vst [vmem:[#allocation2 + $0x48] sm:$0xff] (!%p242_p9), %v1604_v2 }
  0x13   : > { %307 = vst [vmem:[#allocation2 + $0x50] sm:$0xff] (!%p242_p9), %v1604_v2  ;;  %308 = vst [vmem:[#allocation2 + $0x58] sm:$0xff] (!%p242_p9), %v1604_v2  ;;  %1329 = vmatpush3.bf16.msra.mxu0 (!%p242_p9), %v1485_v1 }
  0x14   : > { %309 = vst [vmem:[#allocation2 + $0x60] sm:$0xff] (!%p242_p9), %v1604_v2  ;;  %310 = vst [vmem:[#allocation2 + $0x68] sm:$0xff] (!%p242_p9), %v1604_v2  ;;  %1330 = vmatprep.subr.bf16.mxu0 (!%p242_p9), %v1486_v3 }
  0x15   : > { %s2039_s13 = smov (!%p274_p10, %s1243_s13), 31  ;;  %311 = vst [vmem:[#allocation2 + $0x70] sm:$0xff] %v1604_v2  ;;  %312 = vst [vmem:[#allocation2 + $0x78] sm:$0xff] %v1604_v2 }
  0x16   : > { %s1244_s18 = sshll.u32 %s2039_s13, 3  ;;  %s1544_s13 = sshll.u32 %s1607_s9, 4  ;;  %s1545_s13 = int_to_ptr.vmem [resolvable:$false] %s1544_s13 }
  0x17   : > { %s1711_s23 = scalar_lea.vmem %s2024_s0, %s1244_s18  ;;  %1331 = vmatpush3.bf16.msra.mxu0 %v1486_v3  ;;  %s1605_s18 = smov 112  }
  0x18   : > { %v1714_v4 = vld [vmem:[%s1711_s23 + $0x10] sm:$0xff]  ;;  %v1717_v5 = vld [vmem:[%s1711_s23] sm:$0xff]  ;;  %v1720_v6 = vld [vmem:[%s1711_s23 + $0x18] sm:$0xff]  ;;  %1332 = vmatprep.subr.bf16.mxu0 %v1487_v9  ;;  %s1546_s14 = scalar_lea.vmem %s1545_s13, 4096 }
  0x19   : > { %1508 = vlog2.f32 %v1714_v4  ;;  %v1724_v7 = vld [vmem:[%s1711_s23 + $0x8] sm:$0xff]  ;;  %v1735_v10 = vld [vmem:[%s1711_s23 + $0x20] sm:$0xff]  ;;  %v1739_v11 = vld [vmem:[%s1711_s23 + $0x38] sm:$0xff] }
  0x1a   : > { %1510 = vlog2.f32 %v1717_v5  ;;  %v1728_v8 = vld [vmem:[%s1711_s23 + $0x28] sm:$0xff]  ;;  %v1743_v12 = vld [vmem:[%s1711_s23 + $0x30] sm:$0xff]  ;;  %v1754_v15 = vld [vmem:[%s1711_s23 + $0x40] sm:$0xff] }
  0x1b   : > { %1512 = vlog2.f32 %v1720_v6  ;;  %v1750_v14 = vld [vmem:[%s1711_s23 + $0x48] sm:$0xff]  ;;  %1333 = vmatpush3.bf16.msra.mxu0 %v1487_v9  ;;  %v1761_v17 = vld [vmem:[%s1711_s23 + $0x58] sm:$0xff]  ;;  %v1766_v21 = vld [vmem:[%s1711_s23 + $0x50] sm:$0xff] }
  0x1c   : > { %1514 = vlog2.f32 %v1724_v7  ;;  %1334 = vmatprep.subr.bf16.mxu0 %v1488_v13  ;;  %v1772_v28 = vld [vmem:[%s1711_s23 + $0x68] sm:$0xff]  ;;  %v1776_v32 = vld [vmem:[%s1711_s23 + $0x60] sm:$0xff]  ;;  %v1786_v41 = vld [vmem:[%s1711_s23 + $0x78] sm:$0xff] }
  0x1d   : > { %1516 = vlog2.f32 %v1728_v8  ;;  %v1789_v42 = vld [vmem:[%s1711_s23 + $0x70] sm:$0xff] }
  0x1e   : > { %1518 = vlog2.f32 %v1735_v10 }
  0x1f   : > { %1520 = vlog2.f32 %v1739_v11  ;;  %1335 = vmatpush3.bf16.msra.mxu0 %v1488_v13 }
  0x20   : > { %1522 = vlog2.f32 %v1743_v12  ;;  %1336 = vmatprep.subr.bf16.mxu0 %v1489_v16 }
  0x21   : > { %1524 = vlog2.f32 %v1750_v14 }
  0x22   : > { %1526 = vlog2.f32 %v1754_v15 }
  0x23   : > { %v1509_v18 = vpop.eup %1508  ;;  %1528 = vlog2.f32 %v1761_v17  ;;  %1337 = vmatpush3.bf16.msra.mxu0 %v1489_v16 }
  0x24   : > { %v1511_v19 = vpop.eup %1510  ;;  %v318_v20 = vmul.f32 0.6931472, %v1509_v18  ;;  %1530 = vlog2.f32 %v1766_v21  ;;  %1338 = vmatprep.subr.bf16.mxu0 %v1490_v22 }
  0x25   : > { %v1513_v23 = vpop.eup %1512  ;;  %v314_v24 = vmul.f32 0.6931472, %v1511_v19  ;;  %1532 = vlog2.f32 %v1772_v28 }
  0x26   : > { %v1515_v25 = vpop.eup %1514  ;;  %v347_v26 = vmul.f32 0.4342945, %v318_v20  ;;  %v320_v27 = vmul.f32 0.6931472, %v1513_v23  ;;  %1534 = vlog2.f32 %v1776_v32  ;;  %v1492_v20 = vld [vmem:[%s2027_s3] sm:$0xff]   ;;  %v1494_v23 = vld [vmem:[%s2027_s3 + $0x10] sm:$0xff]  }
  0x27   : > { %v1517_v29 = vpop.eup %1516  ;;  %v345_v30 = vmul.f32 0.4342945, %v314_v24  ;;  %v316_v31 = vmul.f32 0.6931472, %v1515_v25  ;;  %1339 = vmatpush3.bf16.msra.mxu0 %v1490_v22  ;;  %1536 = vlog2.f32 %v1786_v41  ;;  %v1493_v22 = vld [vmem:[%s2027_s3 + $0x8] sm:$0xff]   ;;  %1358 = vmatprep.subr.bf16.mxu1 %v1492_v20  ;;  %v1495_v24 = vld [vmem:[%s2027_s3 + $0x18] sm:$0xff]  }
  0x28   : > { %v1519_v33 = vpop.eup %1518  ;;  %381 = vrot.lane.b32.xlu1 %v347_v26, %s1605_s18  ;;  %v348_v34 = vmul.f32 0.4342945, %v320_v27  ;;  %v324_v35 = vmul.f32 0.6931472, %v1517_v29  ;;  %1340 = vmatprep.subr.bf16.mxu0 %v1491_v40  ;;  %1538 = vlog2.f32 %v1789_v42  ;;  %v1496_v25 = vld [vmem:[%s2027_s3 + $0x20] sm:$0xff]   ;;  %v1497_v26 = vld [vmem:[%s2027_s3 + $0x28] sm:$0xff]  }
  0x29   : > { %v1521_v36 = vpop.eup %1520  ;;  %377 = vrot.lane.b32.xlu0 %v345_v30, %s1605_s18  ;;  %v346_v37 = vmul.f32 0.4342945, %v316_v31  ;;  %v322_v38 = vmul.f32 0.6931472, %v1519_v33  ;;  %1359 = vmatpush3.bf16.msra.mxu1 %v1492_v20  ;;  %v1500_v20 = vld [vmem:[%s2029_s5] sm:$0xff]  }
  0x2a   : > { %v1523_v39 = vpop.eup %1522  ;;  %v350_v43 = vmul.f32 0.4342945, %v324_v35  ;;  %v328_v44 = vmul.f32 0.6931472, %v1521_v36  ;;  %1360 = vmatprep.subr.bf16.mxu1 %v1493_v22 }
  0x2b   : > { %v1525_v45 = vpop.eup %1524  ;;  %v349_v46 = vmul.f32 0.4342945, %v322_v38  ;;  %v326_v47 = vmul.f32 0.6931472, %v1523_v39  ;;  %1341 = vmatpush3.bf16.msra.mxu0 %v1491_v40 }
  0x2c   : > { %383 = vrot.lane.b32.xlu1 %v348_v34, %s1605_s18  ;;  %v1527_v48 = vpop.eup %1526  ;;  %v352_v49 = vmul.f32 0.4342945, %v328_v44  ;;  %v332_v50 = vmul.f32 0.6931472, %v1525_v45  ;;  %1390 = vmatprep.subr.bf16.mxu0 %v1500_v20 }
  0x2d   : > { %379 = vrot.lane.b32.xlu0 %v346_v37, %s1605_s18  ;;  %v1529_v51 = vpop.eup %1528  ;;  %v351_v52 = vmul.f32 0.4342945, %v326_v47  ;;  %v330_v53 = vmul.f32 0.6931472, %v1527_v48  ;;  %1361 = vmatpush3.bf16.msra.mxu1 %v1493_v22  ;;  %v1501_v22 = vld [vmem:[%s2029_s5 + $0x8] sm:$0xff]  }
  0x2e   : > { %v1531_v54 = vpop.eup %1530  ;;  %v354_v55 = vmul.f32 0.4342945, %v332_v50  ;;  %v336_v56 = vmul.f32 0.6931472, %v1529_v51  ;;  %1362 = vmatprep.subr.bf16.mxu1 %v1494_v23 }
  0x2f   : > { %v1533_v57 = vpop.eup %1532  ;;  %v353_v58 = vmul.f32 0.4342945, %v330_v53  ;;  %v334_v59 = vmul.f32 0.6931472, %v1531_v54 }
  0x30   : > { %387 = vrot.lane.b32.xlu1 %v350_v43, %s1605_s18  ;;  %v1535_v60 = vpop.eup %1534  ;;  %v356_v61 = vmul.f32 0.4342945, %v336_v56  ;;  %v340_v62 = vmul.f32 0.6931472, %v1533_v57 }
  0x31   : > { %385 = vrot.lane.b32.xlu0 %v349_v46, %s1605_s18  ;;  %v1537_v63 = vpop.eup %1536  ;;  %v355_v0 = vmul.f32 0.4342945, %v334_v59  ;;  %v338_v1 = vmul.f32 0.6931472, %v1535_v60  ;;  %1363 = vmatpush3.bf16.msra.mxu1 %v1494_v23  ;;  %v1502_v23 = vld [vmem:[%s2029_s5 + $0x10] sm:$0xff]  }
  0x32   : > { %v1539_v2 = vpop.eup %1538  ;;  %v358_v3 = vmul.f32 0.4342945, %v340_v62  ;;  %v344_v9 = vmul.f32 0.6931472, %v1537_v63  ;;  %1364 = vmatprep.subr.bf16.mxu1 %v1495_v24 }
  0x33   : > { %v357_v13 = vmul.f32 0.4342945, %v338_v1  ;;  %v342_v16 = vmul.f32 0.6931472, %v1539_v2 }
  0x34   : > { %391 = vrot.lane.b32.xlu1 %v352_v49, %s1605_s18  ;;  %v360_v18 = vmul.f32 0.4342945, %v344_v9 }
  0x35   : > { %389 = vrot.lane.b32.xlu0 %v351_v52, %s1605_s18  ;;  %v359_v19 = vmul.f32 0.4342945, %v342_v16  ;;  %1365 = vmatpush3.bf16.msra.mxu1 %v1495_v24  ;;  %v1860_v24 = vld [vmem:[%s2029_s5 + $0x18] sm:$0xff]  }
  0x36   : > { %1366 = vmatprep.subr.bf16.mxu1 %v1496_v25 }
  0x38   : > { %395 = vrot.lane.b32.xlu1 %v354_v55, %s1605_s18 }
  0x39   : > { %393 = vrot.lane.b32.xlu0 %v353_v58, %s1605_s18  ;;  %1367 = vmatpush3.bf16.msra.mxu1 %v1496_v25  ;;  %v1866_v25 = vld [vmem:[%s2029_s5 + $0x20] sm:$0xff]  }
  0x3a   : > { %1368 = vmatprep.subr.bf16.mxu1 %v1497_v26 }
  0x3c   : > { %399 = vrot.lane.b32.xlu1 %v356_v61, %s1605_s18 }
  0x3d   : > { %397 = vrot.lane.b32.xlu0 %v355_v0, %s1605_s18  ;;  %1369 = vmatpush3.bf16.msra.mxu1 %v1497_v26  ;;  %v1873_v26 = vld [vmem:[%s2029_s5 + $0x28] sm:$0xff]  }
  0x40   : > { %403 = vrot.lane.b32.xlu1 %v358_v3, %s1605_s18 }
  0x41   : > { %401 = vrot.lane.b32.xlu0 %v357_v13, %s1605_s18 }
  0x44   : > { %407 = vrot.lane.b32.xlu1 %v360_v18, %s1605_s18  ;;  %v1498_v18 = vld [vmem:[%s2027_s3 + $0x30] sm:$0xff]  }
  0x45   : > { %405 = vrot.lane.b32.xlu0 %v359_v19, %s1605_s18  ;;  %1370 = vmatprep.subr.bf16.mxu1 %v1498_v18  ;;  %v1499_v19 = vld [vmem:[%s2027_s3 + $0x38] sm:$0xff]   ;;  %s1242_s18 = sshll.u32 %s270_s17, 7 }
  0x46   : > { %1371 = vmatpush3.bf16.msra.mxu1 %v1498_v18  ;;  %s1942_s19 = scalar_lea.vmem [#allocation3], %s1242_s18 }
  0x47   : > { %1372 = vmatprep.subr.bf16.mxu1 %v1499_v19  ;;  %s1176_s21 = sshll.u32 %s1942_s19, 4  ;;  %s1976_s21 = int_to_ptr.vmem [resolvable:$true] %s1176_s21 }
  0x48   : > { %s1540_s8 = scalar_lea.vmem %s1976_s21, 2048  ;;  %p1547_p0 = scmp.lt.s32.totalorder %s1976_s21, %s1545_s13 }
  0x49   : > { %p1541_p11 = scmp.ne.s32.totalorder %s1976_s21, %s1540_s8  ;;  %p1548_p1 = scmp.lt.s32.totalorder %s1546_s14, %s1540_s8 }
  0x4a   : > { %1373 = vmatpush3.bf16.msra.mxu1 %v1499_v19 }
  0x4b   : > { %1422 = vmatprep.subr.bf16.mxu1 %v1500_v20  ;;  %p1542_p12 = pnand %p1541_p11, %p1688_p5  ;;  %p1549_p2 = por %p1548_p1, %p1547_p0 }
  0x4d   : > { %p1543_p13 = pneg %p1542_p12 }
  0x4f   : > { %p1550_p3 = pnand %p1549_p2, %p1543_p13 }
  0x9a   : > { %v382_v27 = vpop.permute.xlu1 %381 }
  0x9b   : > { %428 = vst.msk [vmem:[#allocation2 + $0x10] sm:$0xff] %vm425_vm0, %v382_v27  ;;  %v378_v29 = vpop.permute.xlu0 %377  ;;  %v1881_v27 = vld [vmem:[%s2026_s2] ss:$0 sm:$0xff] }
  0x9c   : > { %426 = vst.msk [vmem:[#allocation2] sm:$0xff] %vm425_vm0, %v378_v29 }
  0x9e   : > { %v384_v30 = vpop.permute.xlu1 %383 }
  0x9f   : > { %429 = vst.msk [vmem:[#allocation2 + $0x18] sm:$0xff] %vm425_vm0, %v384_v30  ;;  %v380_v31 = vpop.permute.xlu0 %379 }
  0xa0   : > { %427 = vst.msk [vmem:[#allocation2 + $0x8] sm:$0xff] %vm425_vm0, %v380_v31 }
  0xa2   : > { %v388_v33 = vpop.permute.xlu1 %387  ;;  %v444_v36 = vld [vmem:[#allocation2 + $0x10] sm:$0xff] }
  0xa3   : > { %431 = vst.msk [vmem:[#allocation2 + $0x28] sm:$0xff] %vm425_vm0, %v388_v33  ;;  %v386_v34 = vpop.permute.xlu0 %385  ;;  %v442_v39 = vld [vmem:[#allocation2] sm:$0xff] }
  0xa4   : > { %430 = vst.msk [vmem:[#allocation2 + $0x20] sm:$0xff] %vm425_vm0, %v386_v34 }
  0xa6   : > { %v392_v35 = vpop.permute.xlu1 %391  ;;  %v445_v37 = vld [vmem:[#allocation2 + $0x18] sm:$0xff] }
  0xa7   : > { %433 = vst.msk [vmem:[#allocation2 + $0x38] sm:$0xff] %vm425_vm0, %v392_v35  ;;  %v390_v38 = vpop.permute.xlu0 %389  ;;  %v443_v40 = vld [vmem:[#allocation2 + $0x8] sm:$0xff]  ;;  %v459_v43 = vpack.c.bf16 %v445_v37, %v444_v36 }
  0xa8   : > { %432 = vst.msk [vmem:[#allocation2 + $0x30] sm:$0xff] %vm425_vm0, %v390_v38  ;;  %v458_v44 = vpack.c.bf16 %v443_v40, %v442_v39 }
  0xaa   : > { %1342 = vmatprep.mubr.bf16.mxu0 %v458_v44  ;;  %v396_v45 = vpop.permute.xlu1 %395  ;;  %v447_v46 = vld [vmem:[#allocation2 + $0x28] sm:$0xff] }
  0xab   : > { %1343 = vmatmul.mubr.bf16.vlgmr.msra.gmra.mrb[0].mxu0 %v459_v43  ;;  %435 = vst.msk [vmem:[#allocation2 + $0x48] sm:$0xff] %vm425_vm0, %v396_v45  ;;  %v394_v47 = vpop.permute.xlu0 %393  ;;  %v446_v48 = vld [vmem:[#allocation2 + $0x20] sm:$0xff] }
  0xac   : > { %434 = vst.msk [vmem:[#allocation2 + $0x40] sm:$0xff] %vm425_vm0, %v394_v47  ;;  %v460_v49 = vpack.c.bf16 %v447_v46, %v446_v48  ;;  %1391 = vmatpush3.bf16.msra.mxu0 %v1500_v20 }
  0xad   : > { %1392 = vmatprep.subr.bf16.mxu0 %v1501_v22 }
  0xae   : > { %1346 = vmatprep.mubr.bf16.mxu0 %v460_v49  ;;  %v400_v50 = vpop.permute.xlu1 %399  ;;  %v449_v51 = vld [vmem:[#allocation2 + $0x38] sm:$0xff] }
  0xaf   : > { %437 = vst.msk [vmem:[#allocation2 + $0x58] sm:$0xff] %vm425_vm0, %v400_v50  ;;  %v398_v52 = vpop.permute.xlu0 %397  ;;  %v448_v53 = vld [vmem:[#allocation2 + $0x30] sm:$0xff] }
  0xb0   : > { %436 = vst.msk [vmem:[#allocation2 + $0x50] sm:$0xff] %vm425_vm0, %v398_v52  ;;  %v461_v54 = vpack.c.bf16 %v449_v51, %v448_v53  ;;  %1393 = vmatpush3.bf16.msra.mxu0 %v1501_v22 }
  0xb1   : > { %1394 = vmatprep.subr.bf16.mxu0 %v1502_v23 }
  0xb2   : > { %v404_v55 = vpop.permute.xlu1 %403  ;;  %v451_v56 = vld [vmem:[#allocation2 + $0x48] sm:$0xff] }
  0xb3   : > { %1347 = vmatmul.mubr.bf16.gmra.mrb[4].mxu0 %v461_v54  ;;  %439 = vst.msk [vmem:[#allocation2 + $0x68] sm:$0xff] %vm425_vm0, %v404_v55  ;;  %v402_v57 = vpop.permute.xlu0 %401  ;;  %v450_v58 = vld [vmem:[#allocation2 + $0x40] sm:$0xff] }
  0xb4   : > { %438 = vst.msk [vmem:[#allocation2 + $0x60] sm:$0xff] %vm425_vm0, %v402_v57  ;;  %v462_v59 = vpack.c.bf16 %v451_v56, %v450_v58  ;;  %1395 = vmatpush3.bf16.msra.mxu0 %v1502_v23 }
  0xb5   : > { %1396 = vmatprep.subr.bf16.mxu0 %v1860_v24 }
  0xb6   : > { %1350 = vmatprep.mubr.bf16.mxu0 %v462_v59  ;;  %v408_v60 = vpop.permute.xlu1 %407  ;;  %v453_v61 = vld [vmem:[#allocation2 + $0x58] sm:$0xff] }
  0xb7   : > { %441 = vst.msk [vmem:[#allocation2 + $0x78] sm:$0xff] %vm425_vm0, %v408_v60  ;;  %v406_v62 = vpop.permute.xlu0 %405  ;;  %v452_v63 = vld [vmem:[#allocation2 + $0x50] sm:$0xff] }
  0xb8   : > { %440 = vst.msk [vmem:[#allocation2 + $0x70] sm:$0xff] %vm425_vm0, %v406_v62  ;;  %v463_v0 = vpack.c.bf16 %v453_v61, %v452_v63  ;;  %1397 = vmatpush3.bf16.msra.mxu0 %v1860_v24 }
  0xb9   : > { %1398 = vmatprep.subr.bf16.mxu0 %v1866_v25 }
  0xba   : > { %v455_v1 = vld [vmem:[#allocation2 + $0x68] sm:$0xff] }
  0xbb   : > { %1351 = vmatmul.mubr.bf16.gmra.mrb[8].mxu0 %v463_v0  ;;  %v454_v2 = vld [vmem:[#allocation2 + $0x60] sm:$0xff] }
  0xbc   : > { %v464_v3 = vpack.c.bf16 %v455_v1, %v454_v2  ;;  %1399 = vmatpush3.bf16.msra.mxu0 %v1866_v25 }
  0xbd   : > { %1400 = vmatprep.subr.bf16.mxu0 %v1873_v26 }
  0xbe   : > { %1354 = vmatprep.mubr.bf16.mxu0 %v464_v3  ;;  %v457_v9 = vld [vmem:[#allocation2 + $0x78] sm:$0xff] }
  0xbf   : > { %v456_v13 = vld [vmem:[#allocation2 + $0x70] sm:$0xff] }
  0xc0   : > { %v465_v16 = vpack.c.bf16 %v457_v9, %v456_v13  ;;  %1401 = vmatpush3.bf16.msra.mxu0 %v1873_v26 }
  0xc3   : > { %1355 = vmatmul.mubr.bf16.gmra.mrb[12].mxu0 %v465_v16 }
 0x17e   : > { %v1344_v29 = vpop.f32.mrb[0].mxu0 }
 0x17f   : > { %v580_v30 = vadd.f32 %v1344_v29, %v1881_v27  ;;  %v571_v31 = vpop.f32.mrb[1].mxu0 }
 0x180   : > { %v572_v33 = vadd.f32 %v1881_v27, %v571_v31  ;;  %v1345_v34 = vpop.f32.mrb[2].mxu0 }
 0x181   : > { %v583_v35 = vadd.f32 %v1345_v34, %v1881_v27  ;;  %v574_v36 = vpop.f32.mrb[3].mxu0  ;;  %v636_v38 = vmax.f32 %v580_v30, 0.0 }
 0x182   : > { %v575_v37 = vadd.f32 %v1881_v27, %v574_v36  ;;  %v634_v40 = vmax.f32 %v572_v33, 0.0 }
 0x183   : > { %v637_v39 = vmax.f32 %v583_v35, 0.0 }
 0x184   : > { %v635_v43 = vmax.f32 %v575_v37, 0.0 }
 0x185   : > { %v651_v44 = vpack.c.bf16 %v637_v39, %v636_v38 }
 0x186   : > { %v1348_v45 = vpop.f32.mrb[4].mxu0  ;;  %v650_v46 = vpack.c.bf16 %v635_v43, %v634_v40  ;;  %v1506_v43 = vld [vmem:[%s2029_s5 + $0x30] sm:$0xff]  }
 0x187   : > { %v596_v47 = vadd.f32 %v1348_v45, %v1881_v27  ;;  %v587_v48 = vpop.f32.mrb[5].mxu0  ;;  %1402 = vmatprep.subr.bf16.mxu0 %v1506_v43 }
 0x188   : > { %v588_v49 = vadd.f32 %v1881_v27, %v587_v48  ;;  %v1349_v50 = vpop.f32.mrb[6].mxu0  ;;  %1374 = vmatprep.mubr.bf16.mxu1 %v650_v46  ;;  %1403 = vmatpush3.bf16.msra.mxu0 %v1506_v43 }
 0x189   : > { %v599_v51 = vadd.f32 %v1349_v50, %v1881_v27  ;;  %v590_v52 = vpop.f32.mrb[7].mxu0  ;;  %1375 = vmatmul.mubr.bf16.vlgmr.msra.gmra.mrb[0].mxu1 %v651_v44  ;;  %v640_v54 = vmax.f32 %v596_v47, 0.0 }
 0x18a   : > { %v591_v53 = vadd.f32 %v1881_v27, %v590_v52  ;;  %1430 = vmatpush3.bf16.msra.mxu1 %v1500_v20  ;;  %v638_v56 = vmax.f32 %v588_v49, 0.0 }
 0x18b   : > { %v641_v55 = vmax.f32 %v599_v51, 0.0  ;;  %1423 = vmatprep.subr.bf16.mxu1 %v1501_v22 }
 0x18c   : > { %v639_v57 = vmax.f32 %v591_v53, 0.0 }
 0x18d   : > { %v653_v58 = vpack.c.bf16 %v641_v55, %v640_v54 }
 0x18e   : > { %v652_v59 = vpack.c.bf16 %v639_v57, %v638_v56  ;;  %v1352_v60 = vpop.f32.mrb[8].mxu0  ;;  %1431 = vmatpush3.bf16.msra.mxu1 %v1501_v22 }
 0x18f   : > { %v612_v61 = vadd.f32 %v1352_v60, %v1881_v27  ;;  %v603_v62 = vpop.f32.mrb[9].mxu0  ;;  %1424 = vmatprep.subr.bf16.mxu1 %v1502_v23 }
 0x190   : > { %v604_v63 = vadd.f32 %v1881_v27, %v603_v62  ;;  %v1353_v0 = vpop.f32.mrb[10].mxu0  ;;  %1378 = vmatprep.mubr.bf16.mxu1 %v652_v59 }
 0x191   : > { %v615_v1 = vadd.f32 %v1353_v0, %v1881_v27  ;;  %v606_v2 = vpop.f32.mrb[11].mxu0  ;;  %1379 = vmatmul.mubr.bf16.gmra.mrb[4].mxu1 %v653_v58  ;;  %v644_v9 = vmax.f32 %v612_v61, 0.0 }
 0x192   : > { %v607_v3 = vadd.f32 %v1881_v27, %v606_v2  ;;  %1432 = vmatpush3.bf16.msra.mxu1 %v1502_v23  ;;  %v642_v16 = vmax.f32 %v604_v63, 0.0 }
 0x193   : > { %v645_v13 = vmax.f32 %v615_v1, 0.0  ;;  %1425 = vmatprep.subr.bf16.mxu1 %v1860_v24 }
 0x194   : > { %v643_v18 = vmax.f32 %v607_v3, 0.0 }
 0x195   : > { %v655_v19 = vpack.c.bf16 %v645_v13, %v644_v9 }
 0x196   : > { %v654_v20 = vpack.c.bf16 %v643_v18, %v642_v16  ;;  %v1356_v22 = vpop.f32.mrb[12].mxu0  ;;  %1433 = vmatpush3.bf16.msra.mxu1 %v1860_v24 }
 0x197   : > { %v628_v29 = vadd.f32 %v1356_v22, %v1881_v27  ;;  %v619_v30 = vpop.f32.mrb[13].mxu0  ;;  %1426 = vmatprep.subr.bf16.mxu1 %v1866_v25 }
 0x198   : > { %v620_v31 = vadd.f32 %v1881_v27, %v619_v30  ;;  %v1357_v33 = vpop.f32.mrb[14].mxu0  ;;  %1382 = vmatprep.mubr.bf16.mxu1 %v654_v20 }
 0x199   : > { %v631_v23 = vadd.f32 %v1357_v33, %v1881_v27  ;;  %v622_v34 = vpop.f32.mrb[15].mxu0  ;;  %1383 = vmatmul.mubr.bf16.gmra.mrb[8].mxu1 %v655_v19  ;;  %v648_v36 = vmax.f32 %v628_v29, 0.0 }
 0x19a   : > { %v623_v35 = vadd.f32 %v1881_v27, %v622_v34  ;;  %1434 = vmatpush3.bf16.msra.mxu1 %v1866_v25  ;;  %v646_v24 = vmax.f32 %v620_v31, 0.0  ;;  %v1507_v25 = vld [vmem:[%s2029_s5 + $0x38] sm:$0xff]   ;;  %v1606_v27 = vmov 32  }
 0x19b   : > { %v649_v37 = vmax.f32 %v631_v23, 0.0  ;;  %1427 = vmatprep.subr.bf16.mxu1 %v1873_v26  ;;  %1404 = vmatprep.subr.bf16.mxu0 %v1507_v25 }
 0x19c   : > { %v647_v38 = vmax.f32 %v623_v35, 0.0  ;;  %1405 = vmatpush3.bf16.msra.mxu0 %v1507_v25  ;;  %1483 = vset.pattern.permute.xlu1 %v1606_v27 }
 0x19d   : > { %v657_v39 = vpack.c.bf16 %v649_v37, %v648_v36  ;;  %1482 = vset.pattern.permute.xlu0 %v1606_v27  ;;  %1041 = vperm.xlu1 %1483, %v1724_v7  }
 0x19e   : > { %v656_v40 = vpack.c.bf16 %v647_v38, %v646_v24  ;;  %1435 = vmatpush3.bf16.msra.mxu1 %v1873_v26  ;;  %1036 = vperm.xlu0 %1482, %v1717_v5  }
 0x19f   : > { %1428 = vmatprep.subr.bf16.mxu1 %v1506_v43 }
 0x1a0   : > { %1386 = vmatprep.mubr.bf16.mxu1 %v656_v40 }
 0x1a1   : > { %1387 = vmatmul.mubr.bf16.gmra.mrb[12].mxu1 %v657_v39  ;;  %1046 = vperm.xlu1 %1483, %v1714_v4   ;;  %v1254_v4 = vld [vmem:[%s2028_s4] ss:$0 sm:$0xff] }
 0x1a2   : > { %1436 = vmatpush3.bf16.msra.mxu1 %v1506_v43  ;;  %1051 = vperm.xlu0 %1482, %v1720_v6  }
 0x1a3   : > { %1429 = vmatprep.subr.bf16.mxu1 %v1507_v25 }
 0x1a5   : > { %1056 = vperm.xlu1 %1483, %v1735_v10  }
 0x1a6   : > { %1437 = vmatpush3.bf16.msra.mxu1 %v1507_v25  ;;  %1061 = vperm.xlu0 %1482, %v1728_v8   ;;  %v1933_v25 = vld [vmem:[%s2030_s6] ss:$0 sm:$0xff] }
 0x1a9   : > { %1066 = vperm.xlu1 %1483, %v1743_v12  }
 0x1aa   : > { %1071 = vperm.xlu0 %1482, %v1739_v11  }
 0x1ad   : > { %1076 = vperm.xlu1 %1483, %v1754_v15  }
 0x1ae   : > { %1081 = vperm.xlu0 %1482, %v1750_v14  }
 0x1b1   : > { %1086 = vperm.xlu1 %1483, %v1766_v21  }
 0x1b2   : > { %1091 = vperm.xlu0 %1482, %v1761_v17  }
 0x1b5   : > { %1096 = vperm.xlu1 %1483, %v1776_v32  }
 0x1b6   : > { %1101 = vperm.xlu0 %1482, %v1772_v28  }
 0x1b9   : > { %1106 = vperm.xlu1 %1483, %v1789_v42  }
 0x1ba   : > { %1111 = vperm.xlu0 %1482, %v1786_v41  }
 0x21c   : > { %v1042_v24 = vpop.permute.xlu1 %1041 }
 0x21d   : > { %v1037_v38 = vpop.permute.xlu0 %1036 }
 0x220   : > { %v1047_v39 = vpop.permute.xlu1 %1046 }
 0x221   : > { %v1052_v40 = vpop.permute.xlu0 %1051 }
 0x224   : > { %v1057_v43 = vpop.permute.xlu1 %1056 }
 0x225   : > { %v1062_v27 = vpop.permute.xlu0 %1061 }
 0x25c   : > { %v1376_v5 = vpop.f32.mrb[0].mxu1 }
 0x25d   : > { %v772_v6 = vadd.f32 %v1376_v5, %v1254_v4  ;;  %v763_v7 = vpop.f32.mrb[1].mxu1 }
 0x25e   : > { %v764_v8 = vadd.f32 %v1254_v4, %v763_v7  ;;  %v1377_v10 = vpop.f32.mrb[2].mxu1 }
 0x25f   : > { %v775_v11 = vadd.f32 %v1377_v10, %v1254_v4  ;;  %v766_v12 = vpop.f32.mrb[3].mxu1  ;;  %v828_v15 = vmax.f32 %v772_v6, 0.0 }
 0x260   : > { %v767_v14 = vadd.f32 %v1254_v4, %v766_v12  ;;  %v826_v21 = vmax.f32 %v764_v8, 0.0 }
 0x261   : > { %v829_v17 = vmax.f32 %v775_v11, 0.0 }
 0x262   : > { %v827_v28 = vmax.f32 %v767_v14, 0.0  ;;  %v1067_v14 = vpop.permute.xlu1 %1066 }
 0x263   : > { %v843_v32 = vpack.c.bf16 %v829_v17, %v828_v15 }
 0x264   : > { %v842_v42 = vpack.c.bf16 %v827_v28, %v826_v21  ;;  %v1380_v26 = vpop.f32.mrb[4].mxu1 }
 0x265   : > { %v788_v41 = vadd.f32 %v1380_v26, %v1254_v4  ;;  %v779_v44 = vpop.f32.mrb[5].mxu1 }
 0x266   : > { %v780_v45 = vadd.f32 %v1254_v4, %v779_v44  ;;  %v1381_v46 = vpop.f32.mrb[6].mxu1  ;;  %1406 = vmatprep.mubr.bf16.mxu0 %v842_v42 }
 0x267   : > { %v791_v47 = vadd.f32 %v1381_v46, %v1254_v4  ;;  %v782_v48 = vpop.f32.mrb[7].mxu1  ;;  %1407 = vmatmul.mubr.bf16.vlgmr.msra.gmra.mrb[16].mxu0 %v843_v32  ;;  %v832_v50 = vmax.f32 %v788_v41, 0.0  ;;  %v1072_v32 = vpop.permute.xlu0 %1071 }
 0x268   : > { %v783_v49 = vadd.f32 %v1254_v4, %v782_v48  ;;  %v830_v52 = vmax.f32 %v780_v45, 0.0 }
 0x269   : > { %v833_v51 = vmax.f32 %v791_v47, 0.0 }
 0x26a   : > { %v831_v53 = vmax.f32 %v783_v49, 0.0 }
 0x26b   : > { %v845_v54 = vpack.c.bf16 %v833_v51, %v832_v50  ;;  %v1077_v51 = vpop.permute.xlu1 %1076 }
 0x26c   : > { %v844_v55 = vpack.c.bf16 %v831_v53, %v830_v52  ;;  %v1384_v56 = vpop.f32.mrb[8].mxu1 }
 0x26d   : > { %v804_v57 = vadd.f32 %v1384_v56, %v1254_v4  ;;  %v795_v58 = vpop.f32.mrb[9].mxu1 }
 0x26e   : > { %v796_v59 = vadd.f32 %v1254_v4, %v795_v58  ;;  %v1385_v60 = vpop.f32.mrb[10].mxu1  ;;  %1410 = vmatprep.mubr.bf16.mxu0 %v844_v55  ;;  %v1082_v58 = vpop.permute.xlu0 %1081 }
 0x26f   : > { %v807_v61 = vadd.f32 %v1385_v60, %v1254_v4  ;;  %v798_v62 = vpop.f32.mrb[11].mxu1  ;;  %1411 = vmatmul.mubr.bf16.gmra.mrb[20].mxu0 %v845_v54  ;;  %v836_v0 = vmax.f32 %v804_v57, 0.0 }
 0x270   : > { %v799_v63 = vadd.f32 %v1254_v4, %v798_v62  ;;  %v834_v2 = vmax.f32 %v796_v59, 0.0 }
 0x271   : > { %v837_v1 = vmax.f32 %v807_v61, 0.0 }
 0x272   : > { %v835_v3 = vmax.f32 %v799_v63, 0.0 }
 0x273   : > { %v847_v9 = vpack.c.bf16 %v837_v1, %v836_v0 }
 0x274   : > { %v846_v13 = vpack.c.bf16 %v835_v3, %v834_v2  ;;  %v1388_v16 = vpop.f32.mrb[12].mxu1  ;;  %v1087_v3 = vpop.permute.xlu1 %1086 }
 0x275   : > { %v820_v18 = vadd.f32 %v1388_v16, %v1254_v4  ;;  %v811_v19 = vpop.f32.mrb[13].mxu1 }
 0x276   : > { %v812_v20 = vadd.f32 %v1254_v4, %v811_v19  ;;  %v1389_v22 = vpop.f32.mrb[14].mxu1  ;;  %1414 = vmatprep.mubr.bf16.mxu1 %v846_v13 }
 0x277   : > { %v823_v29 = vadd.f32 %v1389_v22, %v1254_v4  ;;  %v814_v30 = vpop.f32.mrb[15].mxu1  ;;  %1415 = vmatmul.mubr.bf16.vlgmr.msra.gmra.mrb[16].mxu1 %v847_v9  ;;  %v840_v33 = vmax.f32 %v820_v18, 0.0  ;;  %v1092_v22 = vpop.permute.xlu0 %1091 }
 0x278   : > { %v815_v31 = vadd.f32 %v1254_v4, %v814_v30  ;;  %v838_v34 = vmax.f32 %v812_v20, 0.0 }
 0x279   : > { %v841_v23 = vmax.f32 %v823_v29, 0.0 }
 0x27a   : > { %v839_v35 = vmax.f32 %v815_v31, 0.0 }
 0x27b   : > { %v849_v36 = vpack.c.bf16 %v841_v23, %v840_v33 }
 0x27c   : > { %v848_v37 = vpack.c.bf16 %v839_v35, %v838_v34 }
 0x27e   : > { %1418 = vmatprep.mubr.bf16.mxu1 %v848_v37 }
 0x27f   : > { %1419 = vmatmul.mubr.bf16.gmra.mrb[20].mxu1 %v849_v36 }
 0x33a   : > { %v1408_v4 = vpop.f32.mrb[16].mxu0 }
 0x33b   : > { %v964_v5 = vadd.f32 %v1408_v4, %v1933_v25  ;;  %v955_v6 = vpop.f32.mrb[17].mxu0  ;;  %v1102_v4 = vpop.permute.xlu0 %1101 }
 0x33c   : > { %v956_v7 = vadd.f32 %v1933_v25, %v955_v6  ;;  %v1409_v8 = vpop.f32.mrb[18].mxu0 }
 0x33d   : > { %v1020_v10 = vmax.f32 %v964_v5, 0.0  ;;  %v967_v11 = vadd.f32 %v1409_v8, %v1933_v25  ;;  %v958_v12 = vpop.f32.mrb[19].mxu0 }
 0x33e   : > { %v1018_v15 = vmax.f32 %v956_v7, 0.0  ;;  %v959_v17 = vadd.f32 %v1933_v25, %v958_v12 }
 0x33f   : > { %v1116_v21 = vmul.f32 %v1047_v39, %v1020_v10  ;;  %v1021_v28 = vmax.f32 %v967_v11, 0.0 }
 0x340   : > { %v1114_v42 = vmul.f32 %v1037_v38, %v1018_v15  ;;  %v1019_v26 = vmax.f32 %v959_v17, 0.0  ;;  %v1097_v38 = vpop.permute.xlu1 %1096 }
 0x341   : > { %v1132_v41 = vmax.f32 %v1116_v21, 1e-20  ;;  %v1117_v44 = vmul.f32 %v1052_v40, %v1021_v28 }
 0x342   : > { %v1130_v45 = vmax.f32 %v1114_v42, 1e-20  ;;  %v1115_v46 = vmul.f32 %v1042_v24, %v1019_v26  ;;  %v1412_v47 = vpop.f32.mrb[20].mxu0 }
 0x343   : > { %1148 = vst [vmem:[%s1942_s19 + $0x10] sm:$0xff] %v1132_v41  ;;  %v1133_v48 = vmax.f32 %v1117_v44, 1e-20  ;;  %v980_v49 = vadd.f32 %v1412_v47, %v1933_v25  ;;  %v971_v50 = vpop.f32.mrb[21].mxu0 }
 0x344   : > { %1146 = vst [vmem:[%s1942_s19] sm:$0xff] %v1130_v45  ;;  %v1131_v52 = vmax.f32 %v1115_v46, 1e-20  ;;  %v972_v53 = vadd.f32 %v1933_v25, %v971_v50  ;;  %v1413_v54 = vpop.f32.mrb[22].mxu0  ;;  %v1112_v45 = vpop.permute.xlu0 %1111 }
 0x345   : > { %1149 = vst [vmem:[%s1942_s19 + $0x18] sm:$0xff] %v1133_v48  ;;  %v1024_v55 = vmax.f32 %v980_v49, 0.0  ;;  %v983_v56 = vadd.f32 %v1413_v54, %v1933_v25  ;;  %v974_v57 = vpop.f32.mrb[23].mxu0 }
 0x346   : > { %1147 = vst [vmem:[%s1942_s19 + $0x8] sm:$0xff] %v1131_v52  ;;  %v1022_v59 = vmax.f32 %v972_v53, 0.0  ;;  %v975_v60 = vadd.f32 %v1933_v25, %v974_v57 }
 0x347   : > { %v1120_v61 = vmul.f32 %v1067_v14, %v1024_v55  ;;  %v1025_v62 = vmax.f32 %v983_v56, 0.0 }
 0x348   : > { %v1118_v63 = vmul.f32 %v1057_v43, %v1022_v59  ;;  %v1023_v0 = vmax.f32 %v975_v60, 0.0 }
 0x349   : > { %v1136_v1 = vmax.f32 %v1120_v61, 1e-20  ;;  %v1121_v2 = vmul.f32 %v1072_v32, %v1025_v62  ;;  %v1107_v32 = vpop.permute.xlu1 %1106 }
 0x34a   : > { %v1134_v9 = vmax.f32 %v1118_v63, 1e-20  ;;  %v1119_v13 = vmul.f32 %v1062_v27, %v1023_v0  ;;  %v1416_v16 = vpop.f32.mrb[16].mxu1 }
 0x34b   : > { %1152 = vst [vmem:[%s1942_s19 + $0x30] sm:$0xff] %v1136_v1  ;;  %v1137_v18 = vmax.f32 %v1121_v2, 1e-20  ;;  %v996_v19 = vadd.f32 %v1416_v16, %v1933_v25  ;;  %v987_v20 = vpop.f32.mrb[17].mxu1 }
 0x34c   : > { %1150 = vst [vmem:[%s1942_s19 + $0x20] sm:$0xff] %v1134_v9  ;;  %v1135_v29 = vmax.f32 %v1119_v13, 1e-20  ;;  %v988_v30 = vadd.f32 %v1933_v25, %v987_v20  ;;  %v1417_v31 = vpop.f32.mrb[18].mxu1 }
 0x34d   : > { %1153 = vst [vmem:[%s1942_s19 + $0x38] sm:$0xff] %v1137_v18  ;;  %v1028_v33 = vmax.f32 %v996_v19, 0.0  ;;  %v999_v23 = vadd.f32 %v1417_v31, %v1933_v25  ;;  %v990_v34 = vpop.f32.mrb[19].mxu1 }
 0x34e   : > { %1151 = vst [vmem:[%s1942_s19 + $0x28] sm:$0xff] %v1135_v29  ;;  %v1026_v35 = vmax.f32 %v988_v30, 0.0  ;;  %v991_v36 = vadd.f32 %v1933_v25, %v990_v34 }
 0x34f   : > { %v1124_v37 = vmul.f32 %v1087_v3, %v1028_v33  ;;  %v1029_v24 = vmax.f32 %v999_v23, 0.0 }
 0x350   : > { %v1122_v39 = vmul.f32 %v1077_v51, %v1026_v35  ;;  %v1027_v40 = vmax.f32 %v991_v36, 0.0 }
 0x351   : > { %v1140_v43 = vmax.f32 %v1124_v37, 1e-20  ;;  %v1125_v27 = vmul.f32 %v1092_v22, %v1029_v24 }
 0x352   : > { %v1138_v5 = vmax.f32 %v1122_v39, 1e-20  ;;  %v1123_v6 = vmul.f32 %v1082_v58, %v1027_v40  ;;  %v1420_v7 = vpop.f32.mrb[20].mxu1 }
 0x353   : > { %1156 = vst [vmem:[%s1942_s19 + $0x50] sm:$0xff] %v1140_v43  ;;  %v1141_v8 = vmax.f32 %v1125_v27, 1e-20  ;;  %v1012_v10 = vadd.f32 %v1420_v7, %v1933_v25  ;;  %v1003_v11 = vpop.f32.mrb[21].mxu1 }
 0x354   : > { %1154 = vst [vmem:[%s1942_s19 + $0x40] sm:$0xff] %v1138_v5  ;;  %v1139_v12 = vmax.f32 %v1123_v6, 1e-20  ;;  %v1004_v14 = vadd.f32 %v1933_v25, %v1003_v11  ;;  %v1421_v15 = vpop.f32.mrb[22].mxu1 }
 0x355   : > { %1157 = vst [vmem:[%s1942_s19 + $0x58] sm:$0xff] %v1141_v8  ;;  %v1032_v17 = vmax.f32 %v1012_v10, 0.0  ;;  %v1015_v21 = vadd.f32 %v1421_v15, %v1933_v25  ;;  %v1006_v28 = vpop.f32.mrb[23].mxu1 }
 0x356   : > { %1155 = vst [vmem:[%s1942_s19 + $0x48] sm:$0xff] %v1139_v12  ;;  %v1030_v42 = vmax.f32 %v1004_v14, 0.0  ;;  %v1007_v26 = vadd.f32 %v1933_v25, %v1006_v28 }
 0x357   : > { %v1128_v41 = vmul.f32 %v1107_v32, %v1032_v17  ;;  %v1033_v44 = vmax.f32 %v1015_v21, 0.0 }
 0x358   : > { %v1126_v46 = vmul.f32 %v1097_v38, %v1030_v42  ;;  %v1031_v47 = vmax.f32 %v1007_v26, 0.0 }
 0x359   : > { %v1144_v48 = vmax.f32 %v1128_v41, 1e-20  ;;  %v1129_v49 = vmul.f32 %v1112_v45, %v1033_v44 }
 0x35a   : > { %v1142_v50 = vmax.f32 %v1126_v46, 1e-20  ;;  %v1127_v51 = vmul.f32 %v1102_v4, %v1031_v47 }
 0x35b   : > { %1160 = vst [vmem:[%s1942_s19 + $0x70] sm:$0xff] %v1144_v48  ;;  %v1145_v52 = vmax.f32 %v1129_v49, 1e-20 }
 0x35c   : > { %1158 = vst [vmem:[%s1942_s19 + $0x60] sm:$0xff] %v1142_v50  ;;  %v1143_v25 = vmax.f32 %v1127_v51, 1e-20 }
 0x35d   : > { %1161 = vst [vmem:[%s1942_s19 + $0x78] sm:$0xff] %v1145_v52 }
 0x35e   : > { %1159 = vst [vmem:[%s1942_s19 + $0x68] sm:$0xff] %v1143_v25 }
 0x35f   : > { %1553 = shalt.err (!%p1550_p3)
}
 0x360   : > { %s1554_s15 = scalar_lea.hbm %s1974_s29, 2048  ;;  %s1558_s18 = scalar_lea.hbm %s2031_s7, 4096 }
 0x361   : > { %p1555_p4 = scmp.ne.s32.totalorder %s1974_s29, %s1554_s15  ;;  %p1559_p9 = scmp.lt.u32.totalorder %s1974_s29, %s2031_s7 }
 0x362   : > { %p1560_p10 = scmp.lt.u32.totalorder %s1558_s18, %s1554_s15  ;;  %p1562_p12 = scmp.lt.u32.totalorder %s1554_s15, %s1974_s29 }
 0x363   : > { %p1556_p7 = pnand %p1555_p4, %p1688_p5 }
 0x364   : > { %p1561_p11 = por %p1560_p10, %p1559_p9 }
 0x365   : > { %p1557_p8 = pneg %p1556_p7 }
 0x366   : > { %p1563_p13 = por %p1562_p12, %p1561_p11 }
 0x368   : > { %p1564_p0 = pnand %p1563_p13, %p1557_p8 }
 0x36a   : > { %1567 = shalt.err (!%p1564_p0)
}
 0x36b   : > { %s1608_s22 = smov 128   ;;  %s1609_s23 = smov 8  }
 0x36c   : > { %1438 = dma.vmem_to_hbm [thread:$0]  (%p1688_p5), %s1976_s21, 2048, %s1974_s29, %s1983_s28, %s1608_s22, %s1608_s22, %s1609_s23  }
 0x36d PF: > { %p1444_p1 = scmp.ge.s32.totalorder %s1602_s27, 2  ;;  %s1191_s8 = sand.u32 1, %s1590_s24  }
 0x36e   : > { %s1192_s9 = scalar_lea.sflag [#allocation4], %s1191_s8 }
 0x36f   : > { %p1441_p2 = pnand %p1444_p1, %p1692_p6 }
 0x371   : > { %1585 = dma.done.wait (!%p1441_p2), %s1192_s9, 2048  }
 0x372   : > { %1587 = vsyncadd (!%p1441_p2), %s1192_s9, 4294965248  ;;  %p17_p3 = scmp.ge.s32.totalorder %s1675_s30, 4   ;;  %s2034_s24 = smov %s1594_s25 }
 0x373   : > { %s2035_s25 = smov %s1598_s26  ;;  %s2036_s26 = smov %s1686_s10 }
 0x374   : > { %s2037_s27 = smov %s1675_s30  ;;  %19 = sbr.rel (!%p17_p3) target bundleno = 3 (0x3), region = 83 }
 0x37b   :  { %1197 = vsyncpa [#allocation4], 1 }
 0x37c   :  { %1199 = vsyncpa [#allocation4 + $0x1], 1 }

</bundles_post_ra>
